<compile_context>
chip_gen: v6e
topology: v6e:2x2x1
jax: 0.10.0
libtpu: 0.0.40
codegen_flags: <defaults>
</compile_context>

<pallas_src>
import math
import numpy as np
import jax
import jax.numpy as jnp
from jax.experimental import pallas as pl
from jax.experimental.pallas import tpu as pltpu


def _vdiffusion_kernel(alpha_ref, beta_ref, x_ref, noise_ref, wT_ref, b_ref,
                       partial_ref):
    """One grid step == one HW tile (all batch samples).

    alpha_ref   : SMEM (B,)          f32   cos(sigma * pi/2) per sample
    beta_ref    : SMEM (B,)          f32   sin(sigma * pi/2) per sample
    x_ref       : VMEM (B, C, T)     f32   clean sample tile (HW on lanes)
    noise_ref   : VMEM (B, C, T)     f32   gaussian noise tile
    wT_ref      : VMEM (C, C)        f32   net weight, transposed (out, in)
    b_ref       : VMEM (C, 1)        f32   net bias (broadcast over lanes)
    partial_ref : SMEM (1, 1)        f32   this tile's sum of squared error
    """
    batch = x_ref.shape[0]
    wT = wT_ref[...]          # (C, C)   -- hoisted out of the batch loop
    bias = b_ref[...]         # (C, 1)   -- lane-broadcast against (C, T)

    sse = jnp.float32(0.0)
    # Static unroll over the (small) batch dimension: per-sample alpha/beta are
    # scalars from SMEM, broadcast over the lane-dense (C, T) tile on the VPU.
    for b in range(batch):
        a = alpha_ref[b]
        be = beta_ref[b]
        x = x_ref[b]          # (C, T)
        n = noise_ref[b]      # (C, T)

        # v-diffusion elementwise hot path (VPU)
        x_noisy = a * x + be * n
        v_target = a * n - be * x

        # synthetic net: 1x1 conv over channels -> MXU matmul (M=C, K=C, N=T)
        v_pred = jnp.dot(wT, x_noisy,
                         preferred_element_type=jnp.float32) + bias

        d = v_pred - v_target
        sse = sse + jnp.sum(d * d)   # cross-lane reduce goes to the XLU

    partial_ref[0, 0] = sse


def _pick_hw_tile(hw, bytes_per_col, budget_bytes=16 * 1024 * 1024):
    """Largest HW tile (multiple of 128 dividing hw, or hw itself) in budget.

    The budget (~16 MiB for the double-buffered x+noise tiles) is conservative
    so the kernel stays comfortably within v7x's 64 MiB VMEM while still using
    big lane-dense tiles on v5e/v6e for small-to-medium problems.
    """
    max_cols = max(128, budget_bytes // max(1, bytes_per_col))
    if hw <= max_cols or hw <= 128:
        return hw
    t = min((max_cols // 128) * 128, (hw // 128) * 128)
    while t >= 128:
        if hw % t == 0:
            return t
        t -= 128
    return hw  # fallback: whole spatial extent (un-tiled last dim)


def vdiffusion_loss(x_nchw, noise_nchw, sigmas, w, bias):
    """Computes the VDiffusion MSE loss.  Inputs in PyTorch NCHW layout."""
    B, C, H, W = x_nchw.shape
    HW = H * W

    # Channel-major, lane-dense layout: (B, C, HW).  Pure reshape, no transpose.
    x = x_nchw.reshape(B, C, HW).astype(jnp.float32)
    noise = noise_nchw.reshape(B, C, HW).astype(jnp.float32)

    # Tiny parameter prep (transpose the (C,C) weight once; column bias).
    wT = jnp.asarray(w, jnp.float32).T            # (C_out, C_in)
    bias_col = jnp.asarray(bias, jnp.float32).reshape(C, 1)

    # Hoist the transcendentals: per-sample alpha/beta computed once here.
    angle = sigmas.astype(jnp.float32) * (math.pi / 2.0)
    alphas = jnp.cos(angle)                        # (B,)
    betas = jnp.sin(angle)                         # (B,)

    # x + noise tiles, double-buffered, f32.
    bytes_per_col = B * C * 4 * 2 * 2
    tile = _pick_hw_tile(HW, bytes_per_col)
    n_tiles = HW // tile

    partials = pl.pallas_call(
        _vdiffusion_kernel,
        out_shape=jax.ShapeDtypeStruct((1, n_tiles), jnp.float32),
        grid=(n_tiles,),
        in_specs=[
            pl.BlockSpec(memory_space=pltpu.MemorySpace.SMEM),        # alphas (B,)
            pl.BlockSpec(memory_space=pltpu.MemorySpace.SMEM),        # betas  (B,)
            pl.BlockSpec((B, C, tile), lambda t: (0, 0, t)),          # x
            pl.BlockSpec((B, C, tile), lambda t: (0, 0, t)),          # noise
            pl.BlockSpec((C, C), lambda t: (0, 0)),                   # net weight^T
            pl.BlockSpec((C, 1), lambda t: (0, 0)),                   # net bias
        ],
        out_specs=pl.BlockSpec((1, 1), lambda t: (0, t),
                               memory_space=pltpu.MemorySpace.SMEM),
        compiler_params=pltpu.CompilerParams(
            dimension_semantics=("parallel",),        # independent per-tile partials
            vmem_limit_bytes=32 * 1024 * 1024),
    )(alphas, betas, x, noise, wT, bias_col)

    # Sum of per-tile partials + statically known element count.
    total_elems = float(B * C * HW)
    return jnp.sum(partials) / total_elems


def vdiffusion_loss_ref(x_nchw, noise_nchw, sigmas, w, bias):
    """Pure-JAX reference matching the PyTorch semantics."""
    B, C, H, W = x_nchw.shape
    angle = sigmas * (math.pi / 2.0)
    alpha = jnp.cos(angle).reshape(B, 1, 1, 1)
    beta = jnp.sin(angle).reshape(B, 1, 1, 1)
    x_noisy = alpha * x_nchw + beta * noise_nchw
    v_target = alpha * noise_nchw - beta * x_nchw
    v_pred = jnp.einsum('bihw,io->bohw', x_noisy, w) + bias.reshape(1, C, 1, 1)
    return jnp.mean((v_pred - v_target) ** 2)


if __name__ == "__main__":
    key = jax.random.PRNGKey(0)
    k_x, k_noise, k_sigma, k_w, k_b = jax.random.split(key, 5)

    B, C, H, W = 2, 8, 16, 16
    x = jax.random.normal(k_x, (B, C, H, W), dtype=jnp.float32)          # NCHW input
    noise = jax.random.normal(k_noise, (B, C, H, W), dtype=jnp.float32)  # randn_like(x)
    # UniformDistribution(0, 1) draw, one sigma per batch element
    sigmas = jax.random.uniform(k_sigma, (B,), dtype=jnp.float32)

    # deterministic synthetic net parameters (1x1 conv over channels)
    w = jax.random.normal(k_w, (C, C), dtype=jnp.float32) * 0.1
    bias = jax.random.normal(k_b, (C,), dtype=jnp.float32) * 0.01

    loss = vdiffusion_loss(x, noise, sigmas, w, bias)
    loss = jax.block_until_ready(loss)

    loss_ref = jax.block_until_ready(vdiffusion_loss_ref(x, noise, sigmas, w, bias))
    np.testing.assert_allclose(np.asarray(loss), np.asarray(loss_ref),
                               rtol=1e-5, atol=1e-5)

    print("KERNEL_OK")
</pallas_src>

<mosaic_0001>
module attributes {stable_mosaic.version = 11 : i64} {
  func.func @_vdiffusion_kernel(%arg0: i32, %arg1: memref<2xf32, #tpu.memory_space<smem>>, %arg2: memref<2xf32, #tpu.memory_space<smem>>, %arg3: memref<2x8x256xf32, #tpu.memory_space<vmem>>, %arg4: memref<2x8x256xf32, #tpu.memory_space<vmem>>, %arg5: memref<8x8xf32, #tpu.memory_space<vmem>>, %arg6: memref<8x1xf32, #tpu.memory_space<vmem>>, %arg7: memref<1x1xf32, #tpu.memory_space<smem>>) attributes {dimension_semantics = [#tpu.dimension_semantics<parallel>], iteration_bounds = array<i64: 1>, scalar_prefetch = 0 : i64, scratch_operands = 0 : i64, tpu.core_type = #tpu.core_type<tc>, window_params = [{transform_indices = @transform_0, window_bounds = array<i64: 2>}, {transform_indices = @transform_1, window_bounds = array<i64: 2>}, {transform_indices = @transform_2, window_bounds = array<i64: 2, 8, 256>}, {transform_indices = @transform_3, window_bounds = array<i64: 2, 8, 256>}, {pipeline_mode = #tpu.pipeline_mode<synchronous>, transform_indices = @transform_4, window_bounds = array<i64: 8, 8>}, {pipeline_mode = #tpu.pipeline_mode<synchronous>, transform_indices = @transform_5, window_bounds = array<i64: 8, 1>}, {transform_indices = @transform_6, window_bounds = array<i64: 1, 1>}]} {
    %c0 = arith.constant 0 : index
    %c0_0 = arith.constant 0 : index
    %0 = vector.load %arg5[%c0, %c0_0] : memref<8x8xf32, #tpu.memory_space<vmem>>, vector<8x8xf32>
    %c0_1 = arith.constant 0 : index
    %c0_2 = arith.constant 0 : index
    %1 = vector.load %arg6[%c0_1, %c0_2] : memref<8x1xf32, #tpu.memory_space<vmem>>, vector<8x1xf32>
    %c0_3 = arith.constant 0 : index
    %2 = memref.load %arg1[%c0_3] : memref<2xf32, #tpu.memory_space<smem>>
    %c0_4 = arith.constant 0 : index
    %3 = memref.load %arg2[%c0_4] : memref<2xf32, #tpu.memory_space<smem>>
    %c0_5 = arith.constant 0 : index
    %c0_6 = arith.constant 0 : index
    %c0_7 = arith.constant 0 : index
    %4 = vector.load %arg3[%c0_5, %c0_6, %c0_7] : memref<2x8x256xf32, #tpu.memory_space<vmem>>, vector<1x8x256xf32>
    %5 = vector.shape_cast %4 : vector<1x8x256xf32> to vector<8x256xf32>
    %c0_8 = arith.constant 0 : index
    %c0_9 = arith.constant 0 : index
    %c0_10 = arith.constant 0 : index
    %6 = vector.load %arg4[%c0_8, %c0_9, %c0_10] : memref<2x8x256xf32, #tpu.memory_space<vmem>>, vector<1x8x256xf32>
    %7 = vector.shape_cast %6 : vector<1x8x256xf32> to vector<8x256xf32>
    %8 = vector.broadcast %2 : f32 to vector<8x256xf32>
    %9 = arith.mulf %8, %5 : vector<8x256xf32>
    %10 = vector.broadcast %3 : f32 to vector<8x256xf32>
    %11 = arith.mulf %10, %7 : vector<8x256xf32>
    %12 = arith.addf %9, %11 : vector<8x256xf32>
    %13 = vector.broadcast %2 : f32 to vector<8x256xf32>
    %14 = arith.mulf %13, %7 : vector<8x256xf32>
    %15 = vector.broadcast %3 : f32 to vector<8x256xf32>
    %16 = arith.mulf %15, %5 : vector<8x256xf32>
    %17 = arith.subf %14, %16 : vector<8x256xf32>
    %cst = arith.constant dense<0.000000e+00> : vector<8x256xf32>
    %18 = tpu.matmul %0, %12, %cst {dimension_numbers = #tpu.dot_dimension_numbers<[1], [0], [0], [1], [0, 0, 1, 1], [], []>} : vector<8x8xf32>, vector<8x256xf32>, vector<8x256xf32> -> vector<8x256xf32>
    %19 = vector.broadcast %1 : vector<8x1xf32> to vector<8x256xf32>
    %20 = arith.addf %18, %19 : vector<8x256xf32>
    %21 = arith.subf %20, %17 : vector<8x256xf32>
    %22 = arith.mulf %21, %21 : vector<8x256xf32>
    %23 = vector.shape_cast %22 : vector<8x256xf32> to vector<1x8x256xf32>
    %cst_11 = arith.constant dense<0.000000e+00> : vector<1xf32>
    %24 = vector.multi_reduction <add>, %23, %cst_11 [1, 2] : vector<1x8x256xf32> to vector<1xf32>
    %25 = vector.shape_cast %24 : vector<1xf32> to vector<1x1x1xf32>
    %26 = vector.extract %25[0, 0, 0] : f32 from vector<1x1x1xf32>
    %cst_12 = arith.constant 0.000000e+00 : f32
    %27 = arith.addf %cst_12, %26 : f32
    %c1 = arith.constant 1 : index
    %28 = memref.load %arg1[%c1] : memref<2xf32, #tpu.memory_space<smem>>
    %c1_13 = arith.constant 1 : index
    %29 = memref.load %arg2[%c1_13] : memref<2xf32, #tpu.memory_space<smem>>
    %c1_14 = arith.constant 1 : index
    %c0_15 = arith.constant 0 : index
    %c0_16 = arith.constant 0 : index
    %30 = vector.load %arg3[%c1_14, %c0_15, %c0_16] : memref<2x8x256xf32, #tpu.memory_space<vmem>>, vector<1x8x256xf32>
    %31 = vector.shape_cast %30 : vector<1x8x256xf32> to vector<8x256xf32>
    %c1_17 = arith.constant 1 : index
    %c0_18 = arith.constant 0 : index
    %c0_19 = arith.constant 0 : index
    %32 = vector.load %arg4[%c1_17, %c0_18, %c0_19] : memref<2x8x256xf32, #tpu.memory_space<vmem>>, vector<1x8x256xf32>
    %33 = vector.shape_cast %32 : vector<1x8x256xf32> to vector<8x256xf32>
    %34 = vector.broadcast %28 : f32 to vector<8x256xf32>
    %35 = arith.mulf %34, %31 : vector<8x256xf32>
    %36 = vector.broadcast %29 : f32 to vector<8x256xf32>
    %37 = arith.mulf %36, %33 : vector<8x256xf32>
    %38 = arith.addf %35, %37 : vector<8x256xf32>
    %39 = vector.broadcast %28 : f32 to vector<8x256xf32>
    %40 = arith.mulf %39, %33 : vector<8x256xf32>
    %41 = vector.broadcast %29 : f32 to vector<8x256xf32>
    %42 = arith.mulf %41, %31 : vector<8x256xf32>
    %43 = arith.subf %40, %42 : vector<8x256xf32>
    %cst_20 = arith.constant dense<0.000000e+00> : vector<8x256xf32>
    %44 = tpu.matmul %0, %38, %cst_20 {dimension_numbers = #tpu.dot_dimension_numbers<[1], [0], [0], [1], [0, 0, 1, 1], [], []>} : vector<8x8xf32>, vector<8x256xf32>, vector<8x256xf32> -> vector<8x256xf32>
    %45 = vector.broadcast %1 : vector<8x1xf32> to vector<8x256xf32>
    %46 = arith.addf %44, %45 : vector<8x256xf32>
    %47 = arith.subf %46, %43 : vector<8x256xf32>
    %48 = arith.mulf %47, %47 : vector<8x256xf32>
    %49 = vector.shape_cast %48 : vector<8x256xf32> to vector<1x8x256xf32>
    %cst_21 = arith.constant dense<0.000000e+00> : vector<1xf32>
    %50 = vector.multi_reduction <add>, %49, %cst_21 [1, 2] : vector<1x8x256xf32> to vector<1xf32>
    %51 = vector.shape_cast %50 : vector<1xf32> to vector<1x1x1xf32>
    %52 = vector.extract %51[0, 0, 0] : f32 from vector<1x1x1xf32>
    %53 = arith.addf %27, %52 : f32
    %c0_22 = arith.constant 0 : index
    %c0_23 = arith.constant 0 : index
    %54 = memref.load %arg7[%c0_22, %c0_23] : memref<1x1xf32, #tpu.memory_space<smem>>
    memref.store %53, %arg7[%c0_22, %c0_23] : memref<1x1xf32, #tpu.memory_space<smem>>
    return
  }
  func.func @transform_0(%arg0: i32) -> i32 {
    %c0_i32 = arith.constant 0 : i32
    %c0_i32_0 = arith.constant 0 : i32
    return %c0_i32 : i32
  }
  func.func @transform_1(%arg0: i32) -> i32 {
    %c0_i32 = arith.constant 0 : i32
    %c0_i32_0 = arith.constant 0 : i32
    return %c0_i32 : i32
  }
  func.func @transform_2(%arg0: i32) -> (i32, i32, i32) {
    %c0_i32 = arith.constant 0 : i32
    %c0_i32_0 = arith.constant 0 : i32
    %c0_i32_1 = arith.constant 0 : i32
    return %c0_i32, %c0_i32_0, %arg0 : i32, i32, i32
  }
  func.func @transform_3(%arg0: i32) -> (i32, i32, i32) {
    %c0_i32 = arith.constant 0 : i32
    %c0_i32_0 = arith.constant 0 : i32
    %c0_i32_1 = arith.constant 0 : i32
    return %c0_i32, %c0_i32_0, %arg0 : i32, i32, i32
  }
  func.func @transform_4(%arg0: i32) -> (i32, i32) {
    %c0_i32 = arith.constant 0 : i32
    %c0_i32_0 = arith.constant 0 : i32
    %c0_i32_1 = arith.constant 0 : i32
    return %c0_i32, %c0_i32_0 : i32, i32
  }
  func.func @transform_5(%arg0: i32) -> (i32, i32) {
    %c0_i32 = arith.constant 0 : i32
    %c0_i32_0 = arith.constant 0 : i32
    %c0_i32_1 = arith.constant 0 : i32
    return %c0_i32, %c0_i32_0 : i32, i32
  }
  func.func @transform_6(%arg0: i32) -> (i32, i32) {
    %c0_i32 = arith.constant 0 : i32
    %c0_i32_0 = arith.constant 0 : i32
    return %c0_i32, %arg0 : i32, i32
  }
}

</mosaic_0001>

<bundles_post_ra>
// kernel: tpu_custom_call.1
= control target key start
LH: loop header
LB: loop body
LE: loop exit
PB: predicated region body
PF: predicated region fallthrough
CT: control target
= control target key end

     0   :  { %11 = vsyncpa [#allocation5], 0  ;;  %s488_s0 = inlined_call_operand.vmem [shape: f32[2], index: 0, kind: input, shape index: {}]   ;;  %s489_s1 = inlined_call_operand.vmem [shape: f32[2], index: 1, kind: input, shape index: {}]   ;;  %s490_s2 = inlined_call_operand.hbm [shape: f32[2,8,256], index: 2, kind: input, shape index: {}]   ;;  %s491_s3 = inlined_call_operand.hbm [shape: f32[2,8,256], index: 3, kind: input, shape index: {}]   ;;  %s492_s4 = inlined_call_operand.vmem [shape: f32[8,8], index: 4, kind: input, shape index: {}]   ;;  %s493_s5 = inlined_call_operand.vmem [shape: f32[8,1], index: 5, kind: input, shape index: {}]   ;;  %s494_s6 = inlined_call_operand.hbm [shape: f32[1,1], index: 6, kind: output, shape index: {}]  }
   0x1   :  { %12 = vsyncpa [#allocation7], 0 }
   0x2   :  { %13 = vsyncpa [#allocation3], 0 }
   0x3   :  { %14 = vsyncpa [#allocation10], 0 }
   0x4   :  { %15 = vsyncpa [#allocation4], 0  ;;  %s22_s23 = sshll.u32 %s488_s0, 4  ;;  %s32_s26 = sshll.u32 %s489_s1, 4  ;;  %s23_s23 = int_to_ptr.vmem [resolvable:$true] %s22_s23  ;;  %s33_s26 = int_to_ptr.vmem [resolvable:$true] %s32_s26 }
   0x5   :  { %s339_s27 = scalar_lea.vmem %s23_s23, 16  ;;  %p344_p1 = scmp.lt.s32.totalorder %s23_s23, %s23_s23 }
   0x6   :  { %p340_p0 = scmp.ne.s32.totalorder %s23_s23, %s339_s27  ;;  %p345_p2 = scmp.lt.s32.totalorder %s339_s27, %s339_s27 }
   0x8   :  { %p346_p3 = por %p345_p2, %p344_p1 }
   0xa   :  { %p347_p4 = pnand %p346_p3, %p340_p0 }
   0xc   :  { %350 = shalt.err (!%p347_p4)
}
   0xd   :  { %s421_s28 = smov [#allocation2]   ;;  %s351_s29 = scalar_lea.vmem %s33_s26, 16 }
   0xe   :  { %25 = dma.vmem_to_smem %s23_s23, 16, %s421_s28, [#allocation5]  }
   0xf   :  { %p352_p5 = scmp.ne.s32.totalorder %s33_s26, %s351_s29  ;;  %p356_p6 = scmp.lt.s32.totalorder %s33_s26, %s33_s26 }
  0x10   :  { %p357_p7 = scmp.lt.s32.totalorder %s351_s29, %s351_s29 }
  0x12   :  { %p358_p8 = por %p357_p7, %p356_p6 }
  0x14   :  { %p359_p9 = pnand %p358_p8, %p352_p5 }
  0x16   :  { %362 = shalt.err (!%p359_p9)
}
  0x17   :  { %s422_s0 = smov [#allocation6]   ;;  %s423_s1 = smov [#allocation8]  }
  0x18   :  { %35 = dma.vmem_to_smem %s33_s26, 16, %s422_s0, [#allocation7]  }
  0x19   :  { %s41_s30 = sshll.u32 %s423_s1, 4  ;;  %s42_s30 = int_to_ptr.vmem [resolvable:$true] %s41_s30 }
  0x1a   :  { %s371_s7 = scalar_lea.vmem %s42_s30, 512  ;;  %p376_p11 = scmp.lt.s32.totalorder %s42_s30, %s42_s30 }
  0x1b   :  { %p372_p10 = scmp.ne.s32.totalorder %s42_s30, %s371_s7  ;;  %p377_p12 = scmp.lt.s32.totalorder %s371_s7, %s371_s7 }
  0x1d   :  { %p378_p13 = por %p377_p12, %p376_p11 }
  0x1f   :  { %p379_p0 = pnand %p378_p13, %p372_p10 }
  0x21   :  { %382 = shalt.err (!%p379_p0)
}
  0x22   :  { %s424_s8 = smov 256   ;;  %s425_s9 = smov 16  }
  0x23   :  { %47 = dma.hbm_to_vmem [thread:$0]  %s490_s2, 512, %s42_s30, [#allocation3], %s424_s8, %s424_s8, %s425_s9  }
  0x24   :  { %s426_s12 = smov [#allocation9]  }
  0x25   :  { %s53_s13 = sshll.u32 %s426_s12, 4  ;;  %s54_s13 = int_to_ptr.vmem [resolvable:$true] %s53_s13 }
  0x26   :  { %s391_s14 = scalar_lea.vmem %s54_s13, 512  ;;  %p396_p2 = scmp.lt.s32.totalorder %s54_s13, %s54_s13 }
  0x27   :  { %p392_p1 = scmp.ne.s32.totalorder %s54_s13, %s391_s14  ;;  %p397_p3 = scmp.lt.s32.totalorder %s391_s14, %s391_s14 }
  0x29   :  { %p398_p4 = por %p397_p3, %p396_p2 }
  0x2b   :  { %p399_p5 = pnand %p398_p4, %p392_p1 }
  0x2d   :  { %402 = shalt.err (!%p399_p5)
}
  0x2e   :  { %59 = dma.hbm_to_vmem [thread:$0]  %s491_s3, 512, %s54_s13, [#allocation10], %s424_s8, %s424_s8, %s425_s9  }
  0x2f   :  { %411 = dma.done.wait [#allocation5], 16  }
  0x30   :  { %412 = vsyncadd [#allocation5], 4294967280 }
  0x31   :  { %413 = dma.done.wait [#allocation7], 16  }
  0x32   :  { %414 = vsyncadd [#allocation7], 4294967280 }
  0x33   :  { %415 = dma.done.wait [#allocation3], 512  }
  0x34   :  { %416 = vsyncadd [#allocation3], 4294966784 }
  0x35   :  { %417 = dma.done.wait [#allocation10], 512  }
  0x36   :  { %418 = vsyncadd [#allocation10], 4294966784 }
  0x37   :  { %76 = sfence }
  0x38   :  { %s79_s2 = sld [smem:[#allocation2]]  ;;  %v427_v0 = vmov 0.0   ;;  %v428_v1 = vmov 0   ;;  %v78_v2 = vld [vmem:[%s493_s5] sm:$0xff]  ;;  %v82_v3 = vld [vmem:[#allocation8 + $0x8] sm:$0xff]  ;;  %v198_v8 = vld [vmem:[#allocation8 + $0x18] sm:$0xff] }
  0x39   :  { %s80_s17 = sld [smem:[#allocation6]]  ;;  %172 = vmatprep.mubr.f32.mxu0 %v427_v0  ;;  %280 = vmatprep.mubr.f32.mxu1 %v427_v0  ;;  %v81_v4 = vld [vmem:[#allocation8] sm:$0xff]  ;;  %v84_v5 = vld [vmem:[#allocation9 + $0x8] sm:$0xff]  ;;  %vm104_vm0 = vcmask 64512   ;;  %v201_v12 = vld [vmem:[#allocation9 + $0x18] sm:$0xff]  ;;  %s429_s24 = smov [#allocation11]  }
  0x3a   :  { %s322_s18 = sld [smem:[#allocation2 + $0x1]]  ;;  %338 = vset.pattern.permute.xlu0 %v428_v1  ;;  %v83_v6 = vld [vmem:[#allocation9] sm:$0xff]  ;;  %v197_v18 = vld [vmem:[#allocation8 + $0x10] sm:$0xff] }
  0x3b   :  { %s323_s19 = sld [smem:[#allocation6 + $0x1]]  ;;  %101 = vperm.xlu0 %338, %v78_v2   ;;  %v200_v19 = vld [vmem:[#allocation9 + $0x10] sm:$0xff]  ;;  %v77_v32 = vld [vmem:[%s492_s4] sm:$0xff] }
  0x3e   :  { %v85_v7 = vstv %s79_s2 }
  0x3f   :  { %v87_v9 = vmul.f32 %v85_v7, %v82_v3  ;;  %v88_v10 = vstv %s80_s17  ;;  %v94_v11 = vmul.f32 %v85_v7, %v84_v5  ;;  %v86_v13 = vmul.f32 %v85_v7, %v81_v4 }
  0x40   :  { %v90_v14 = vmul.f32 %v88_v10, %v84_v5  ;;  %v96_v15 = vmul.f32 %v88_v10, %v82_v3  ;;  %v202_v16 = vstv %s322_s18  ;;  %v89_v17 = vmul.f32 %v88_v10, %v83_v6 }
  0x41   :  { %v204_v20 = vmul.f32 %v202_v16, %v198_v8  ;;  %v205_v21 = vstv %s323_s19  ;;  %v211_v22 = vmul.f32 %v202_v16, %v201_v12  ;;  %v93_v23 = vmul.f32 %v85_v7, %v83_v6 }
  0x42   :  { %v92_v24 = vadd.f32 %v90_v14, %v87_v9  ;;  %v207_v25 = vmul.f32 %v205_v21, %v201_v12  ;;  %v213_v26 = vmul.f32 %v205_v21, %v198_v8  ;;  %v91_v27 = vadd.f32 %v89_v17, %v86_v13 }
  0x43   :  { %v95_v28 = vmul.f32 %v88_v10, %v81_v4  ;;  %v203_v29 = vmul.f32 %v202_v16, %v197_v18  ;;  %v206_v30 = vmul.f32 %v205_v21, %v200_v19  ;;  %v210_v31 = vmul.f32 %v202_v16, %v200_v19 }
  0x44   :  { %138 = vmatprep.subr.mxu0 %v92_v24  ;;  %v209_v33 = vadd.f32 %v207_v25, %v204_v20  ;;  %v212_v34 = vmul.f32 %v205_v21, %v197_v18  ;;  %v98_v38 = vsub.f32 %v94_v11, %v96_v15  ;;  %v215_v39 = vsub.f32 %v211_v22, %v213_v26 }
  0x45   :  { %139 = vmatpush1.msra.mxu0 %v91_v27  ;;  %v208_v35 = vadd.f32 %v206_v30, %v203_v29  ;;  %v97_v36 = vsub.f32 %v93_v23, %v95_v28 }
  0x46   :  { %246 = vmatprep.subr.mxu1 %v209_v33  ;;  %321 = vmatmul.mubr.msk.f32.vlgmr.msra.gmra.mxu0 %vm104_vm0, %v77_v32  ;;  %v214_v37 = vsub.f32 %v210_v31, %v212_v34 }
  0x47   :  { %247 = vmatpush1.msra.mxu1 %v208_v35 }
  0x48   :  { %324 = vmatmul.mubr.msk.f32.vlgmr.msra.gmra.mxu1 %vm104_vm0, %v77_v32 }
  0xb6   :  { %v102_v40 = vpop.permute.xlu0 %101 }
 0x106   :  { %v174_v41 = vpop.f32.mrf.mxu0 }
 0x107   :  { %v175_v42 = vadd.f32 %v174_v41, %v102_v40 }
 0x108   :  { %v282_v43 = vpop.f32.mrf.mxu1  ;;  %v176_v44 = vpop.f32.mrf.mxu0 }
 0x109   :  { %v179_v45 = vsub.f32 %v175_v42, %v97_v36  ;;  %v283_v46 = vadd.f32 %v282_v43, %v102_v40  ;;  %v177_v47 = vadd.f32 %v176_v44, %v102_v40 }
 0x10a   :  { %v284_v48 = vpop.f32.mrf.mxu1 }
 0x10b   :  { %v180_v49 = vsub.f32 %v177_v47, %v98_v38  ;;  %v285_v50 = vadd.f32 %v284_v48, %v102_v40  ;;  %v287_v51 = vsub.f32 %v283_v46, %v214_v37  ;;  %v181_v52 = vmul.f32 %v179_v45, %v179_v45 }
 0x10d   :  { %v182_v53 = vmul.f32 %v180_v49, %v180_v49  ;;  %v288_v54 = vsub.f32 %v285_v50, %v215_v39  ;;  %v289_v55 = vmul.f32 %v287_v51, %v287_v51 }
 0x10f   :  { %v290_v56 = vmul.f32 %v288_v54, %v288_v54  ;;  %v183_v57 = vadd.f32 %v182_v53, %v181_v52 }
 0x111   :  { %v291_v58 = vadd.f32 %v290_v56, %v289_v55  ;;  %184 = vadd.xlane.f32.xlu0 %v183_v57 }
 0x113   :  { %292 = vadd.xlane.f32.xlu1 %v291_v58 }
 0x19a   :  { %v185_v59 = vpop.xlane.xlu0 %184 }
 0x19b   :  { %v186_v60 = vrot.slane %v185_v59, 4 }
 0x19c   :  { %v293_v61 = vpop.xlane.xlu1 %292 }
 0x19d   :  { %v294_v62 = vrot.slane %v293_v61, 4  ;;  %v187_v63 = vadd.f32 %v186_v60, %v185_v59 }
 0x19f   :  { %v295_v0 = vadd.f32 %v294_v62, %v293_v61  ;;  %v188_v1 = vrot.slane %v187_v63, 2 }
 0x1a1   :  { %v296_v2 = vrot.slane %v295_v0, 2  ;;  %v189_v3 = vadd.f32 %v188_v1, %v187_v63 }
 0x1a3   :  { %v297_v4 = vadd.f32 %v296_v2, %v295_v0  ;;  %v190_v5 = vrot.slane %v189_v3, 1 }
 0x1a5   :  { %v191_v6 = vadd.f32 %v190_v5, %v189_v3  ;;  %v298_v7 = vrot.slane %v297_v4, 1 }
 0x1a7   :  { %325 = vpush %v191_v6  ;;  %v299_v8 = vadd.f32 %v298_v7, %v297_v4 }
 0x1a9   :  { %327 = vpush %v299_v8 }
 0x1d8   :  { %s326_s4 = spop %325 }
 0x1da   :  { %s328_s22 = spop %327 }
 0x1db   :  { %s301_s23 = sadd.f32 %s328_s22, %s326_s4 }
 0x1dd   :  { %303 = sst [smem:[#allocation11]] %s301_s23 }
 0x1de   :  { %311 = dma.smem_to_hbm %s429_s24, 16, %s494_s6, [#allocation4]  }
 0x1df   :  { %419 = dma.done.wait [#allocation4], 16  }
 0x1e0   :  { %420 = vsyncadd [#allocation4], 4294967280 }
 0x1e1   :  { %315 = sfence }
 0x1e2   :  { %316 = vsyncpa [#allocation3], 1 }
 0x1e3   :  { %317 = vsyncpa [#allocation10], 1 }
 0x1e4   :  { %318 = vsyncpa [#allocation4], 1 }
 0x1e5   :  { %319 = vsyncpa [#allocation5], 1 }
 0x1e6   :  { %320 = vsyncpa [#allocation7], 1 }

</bundles_post_ra>
